<compile_context>
chip_gen: v6e
topology: v6e:2x2x1
jax: 0.10.0
libtpu: 0.0.40
codegen_flags: <defaults>
</compile_context>

<pallas_src>
import functools

import jax
import jax.numpy as jnp
from jax import lax
from jax.experimental import pallas as pl
from jax.experimental.pallas import tpu as pltpu

BN_EPS = 1e-3


def _residual_kernel(x_ref, w1_ref, b1_ref, w2_ref, b2_ref, o_ref, *, wp):
    # x_ref : (1, C, TOT)  f32   zero-padded activation, spatial flattened
    #                            TOT = (H+3)*(W+2); pad = 1 top, 2 bottom,
    #                            1 left, 1 right (extra bottom row keeps the
    #                            widest shifted slice in bounds)
    # w1_ref: (9, Cm, C)   bf16  3x3 conv taps (k = ky*3+kx), BN1 scale folded
    # b1_ref: (Cm, 1)      f32   folded BN1 bias
    # w2_ref: (C, Cm)      bf16  1x1 conv weights, BN2 scale folded
    # b2_ref: (C, 1)       f32   folded BN2 bias
    # o_ref : (1, C, L)    f32   "wide" output, L = H*(W+2); columns
    #                            h*(W+2)+w with w < W are the valid outputs
    x = x_ref[0]                                    # (C, TOT) f32
    L = o_ref.shape[-1]

    # 3x3 conv as 9 shifted matmuls (in-VMEM im2col via static lane slices).
    acc = None
    for ky in range(3):
        for kx in range(3):
            s = ky * wp + kx
            xs = x[:, s:s + L].astype(jnp.bfloat16)            # (C, L) bf16
            d = jnp.dot(w1_ref[3 * ky + kx], xs,               # (Cm,C)@(C,L)
                        preferred_element_type=jnp.float32)
            acc = d if acc is None else acc + d                # (Cm, L) f32

    # Folded BN1 bias + SiLU (f32 on VPU/EUP).
    y = acc + b1_ref[...]
    y = y * jax.nn.sigmoid(y)

    # 1x1 conv (+ folded BN2 bias) and residual add (skip path stays f32).
    y = jnp.dot(w2_ref[...], y.astype(jnp.bfloat16),
                preferred_element_type=jnp.float32)            # (C, L) f32
    y = y + b2_ref[...]
    skip = x[:, wp + 1:wp + 1 + L]                             # original x
    o_ref[0] = (skip + y).astype(o_ref.dtype)


def residual_forward(x_nchw, params):
    """Pallas implementation of Residual(in_ch, out_ch=in_ch, s=1, r=2, fused=True)."""
    (w1, g1, be1, m1, v1, w2, g2, be2, m2, v2) = params
    N, C, H, W = x_nchw.shape
    Cm = w1.shape[0]                  # r * in_ch
    Cout = w2.shape[0]
    assert Cout == C, "this config has add=True, so out_ch == in_ch"

    Wp = W + 2                        # width incl. left/right zero pad
    Hp = H + 3                        # 1 top + 2 bottom zero rows (see kernel)
    TOT = Hp * Wp
    L = H * Wp                        # wide output lanes per image

    # Zero-pad and flatten spatial dims; stay in NCHW (channels on sublanes,
    # flattened spatial on lanes).  This is the only wrapper-side data movement.
    x = x_nchw.astype(jnp.float32)
    xpad = jnp.pad(x, ((0, 0), (0, 0), (1, 2), (1, 1))).reshape(N, C, TOT)

    # Fold BatchNorm (inference mode) into the conv weights; keep biases only.
    s1 = g1 / jnp.sqrt(v1 + BN_EPS)
    b1 = be1 - m1 * s1
    s2 = g2 / jnp.sqrt(v2 + BN_EPS)
    b2 = be2 - m2 * s2

    # (Cm, C, 3, 3) -> (9, Cm, C) taps ordered k = ky*3+kx, BN1-scaled, bf16.
    w1_taps = (jnp.transpose(w1, (2, 3, 0, 1)).reshape(9, Cm, C)
               * s1[None, :, None]).astype(jnp.bfloat16)
    # (Cout, Cm, 1, 1) -> (Cout, Cm), BN2-scaled, bf16.
    w2_mat = (w2[:, :, 0, 0] * s2[:, None]).astype(jnp.bfloat16)
    b1c = b1.reshape(Cm, 1).astype(jnp.float32)
    b2c = b2.reshape(C, 1).astype(jnp.float32)

    out_wide = pl.pallas_call(
        functools.partial(_residual_kernel, wp=Wp),
        out_shape=jax.ShapeDtypeStruct((N, C, L), jnp.float32),
        grid=(N,),
        in_specs=[
            pl.BlockSpec((1, C, TOT), lambda n: (n, 0, 0)),   # padded activation
            pl.BlockSpec((9, Cm, C), lambda n: (0, 0, 0)),    # 3x3 taps (resident)
            pl.BlockSpec((Cm, 1), lambda n: (0, 0)),          # BN1 bias
            pl.BlockSpec((C, Cm), lambda n: (0, 0)),          # 1x1 weights
            pl.BlockSpec((C, 1), lambda n: (0, 0)),           # BN2 bias
        ],
        out_specs=pl.BlockSpec((1, C, L), lambda n: (n, 0, 0)),
        compiler_params=pltpu.CompilerParams(
            dimension_semantics=("parallel",)),
    )(xpad, w1_taps, b1c, w2_mat, b2c)

    # Drop the two padding columns per row: (N, C, H*(W+2)) -> (N, C, H, W).
    return out_wide.reshape(N, C, H, Wp)[:, :, :, :W]


def residual_reference(x_nchw, params):
    """Plain-JAX reference (matches PyTorch eval-mode forward)."""
    (w1, g1, be1, m1, v1, w2, g2, be2, m2, v2) = params
    x = x_nchw.astype(jnp.float32)

    def bn(y, g, b, m, v):
        inv = g / jnp.sqrt(v + BN_EPS)
        return y * inv[None, :, None, None] + (b - m * inv)[None, :, None, None]

    y = lax.conv_general_dilated(x, w1, (1, 1), ((1, 1), (1, 1)),
                                 dimension_numbers=("NCHW", "OIHW", "NCHW"))
    y = bn(y, g1, be1, m1, v1)
    y = y * jax.nn.sigmoid(y)                                         # SiLU
    y = lax.conv_general_dilated(y, w2, (1, 1), ((0, 0), (0, 0)),
                                 dimension_numbers=("NCHW", "OIHW", "NCHW"))
    y = bn(y, g2, be2, m2, v2)                                        # identity
    return x + y                                                      # add=True


if __name__ == "__main__":
    N, C, H, W = 2, 4, 16, 16
    r = 2
    Cm = r * C

    key = jax.random.PRNGKey(0)
    keys = jax.random.split(key, 11)
    x = jax.random.normal(keys[0], (N, C, H, W), jnp.float32)

    # Deterministic synthetic parameters (shapes from Residual.__init__).
    w1 = jax.random.normal(keys[1], (Cm, C, 3, 3), jnp.float32) * 0.2     # Conv1 3x3, no bias
    g1 = jax.random.uniform(keys[2], (Cm,), jnp.float32, 0.5, 1.5)        # BN1 gamma
    be1 = jax.random.normal(keys[3], (Cm,), jnp.float32) * 0.1            # BN1 beta
    m1 = jax.random.normal(keys[4], (Cm,), jnp.float32) * 0.1             # BN1 running_mean
    v1 = jax.random.uniform(keys[5], (Cm,), jnp.float32, 0.5, 1.5)        # BN1 running_var
    w2 = jax.random.normal(keys[6], (C, Cm, 1, 1), jnp.float32) * 0.2     # Conv2 1x1, no bias
    g2 = jax.random.uniform(keys[7], (C,), jnp.float32, 0.5, 1.5)
    be2 = jax.random.normal(keys[8], (C,), jnp.float32) * 0.1
    m2 = jax.random.normal(keys[9], (C,), jnp.float32) * 0.1
    v2 = jax.random.uniform(keys[10], (C,), jnp.float32, 0.5, 1.5)
    params = (w1, g1, be1, m1, v1, w2, g2, be2, m2, v2)

    out = residual_forward(x, params)
    out = jax.block_until_ready(out)
    assert out.shape == (N, C, H, W)

    ref = residual_reference(x, params)
    max_err = float(jnp.max(jnp.abs(out - ref)))
    # bf16 MXU operands (f32 accumulation, f32 skip path) -> expect ~1e-2 max.
    assert max_err < 2e-2, f"mismatch vs reference, max abs err = {max_err}"

    print("KERNEL_OK")
</pallas_src>

<mosaic_0001>
module attributes {stable_mosaic.version = 11 : i64} {
  func.func @_residual_kernel(%arg0: i32, %arg1: memref<1x4x342xf32, #tpu.memory_space<vmem>>, %arg2: memref<9x8x4xbf16, #tpu.memory_space<vmem>>, %arg3: memref<8x1xf32, #tpu.memory_space<vmem>>, %arg4: memref<4x8xbf16, #tpu.memory_space<vmem>>, %arg5: memref<4x1xf32, #tpu.memory_space<vmem>>, %arg6: memref<1x4x288xf32, #tpu.memory_space<vmem>>) attributes {dimension_semantics = [#tpu.dimension_semantics<parallel>], iteration_bounds = array<i64: 2>, scalar_prefetch = 0 : i64, scratch_operands = 0 : i64, tpu.core_type = #tpu.core_type<tc>, window_params = [{transform_indices = @transform_0, window_bounds = array<i64: 1, 4, 342>}, {pipeline_mode = #tpu.pipeline_mode<synchronous>, transform_indices = @transform_1, window_bounds = array<i64: 9, 8, 4>}, {pipeline_mode = #tpu.pipeline_mode<synchronous>, transform_indices = @transform_2, window_bounds = array<i64: 8, 1>}, {pipeline_mode = #tpu.pipeline_mode<synchronous>, transform_indices = @transform_3, window_bounds = array<i64: 4, 8>}, {pipeline_mode = #tpu.pipeline_mode<synchronous>, transform_indices = @transform_4, window_bounds = array<i64: 4, 1>}, {transform_indices = @transform_5, window_bounds = array<i64: 1, 4, 288>}]} {
    %c0 = arith.constant 0 : index
    %c0_0 = arith.constant 0 : index
    %c0_1 = arith.constant 0 : index
    %0 = vector.load %arg1[%c0, %c0_0, %c0_1] : memref<1x4x342xf32, #tpu.memory_space<vmem>>, vector<1x4x342xf32>
    %1 = vector.shape_cast %0 : vector<1x4x342xf32> to vector<4x342xf32>
    %2 = vector.extract_strided_slice %1 {offsets = [0, 0], sizes = [4, 288], strides = [1, 1]} : vector<4x342xf32> to vector<4x288xf32>
    %3 = arith.truncf %2 : vector<4x288xf32> to vector<4x288xbf16>
    %c0_2 = arith.constant 0 : index
    %c0_3 = arith.constant 0 : index
    %c0_4 = arith.constant 0 : index
    %4 = vector.load %arg2[%c0_2, %c0_3, %c0_4] : memref<9x8x4xbf16, #tpu.memory_space<vmem>>, vector<1x8x4xbf16>
    %5 = vector.shape_cast %4 : vector<1x8x4xbf16> to vector<8x4xbf16>
    %cst = arith.constant dense<0.000000e+00> : vector<8x288xf32>
    %6 = tpu.matmul %5, %3, %cst {dimension_numbers = #tpu.dot_dimension_numbers<[1], [0], [0], [1], [0, 0, 1, 1], [], []>} : vector<8x4xbf16>, vector<4x288xbf16>, vector<8x288xf32> -> vector<8x288xf32>
    %7 = vector.extract_strided_slice %1 {offsets = [0, 1], sizes = [4, 288], strides = [1, 1]} : vector<4x342xf32> to vector<4x288xf32>
    %8 = arith.truncf %7 : vector<4x288xf32> to vector<4x288xbf16>
    %c1 = arith.constant 1 : index
    %c0_5 = arith.constant 0 : index
    %c0_6 = arith.constant 0 : index
    %9 = vector.load %arg2[%c1, %c0_5, %c0_6] : memref<9x8x4xbf16, #tpu.memory_space<vmem>>, vector<1x8x4xbf16>
    %10 = vector.shape_cast %9 : vector<1x8x4xbf16> to vector<8x4xbf16>
    %cst_7 = arith.constant dense<0.000000e+00> : vector<8x288xf32>
    %11 = tpu.matmul %10, %8, %cst_7 {dimension_numbers = #tpu.dot_dimension_numbers<[1], [0], [0], [1], [0, 0, 1, 1], [], []>} : vector<8x4xbf16>, vector<4x288xbf16>, vector<8x288xf32> -> vector<8x288xf32>
    %12 = arith.addf %6, %11 : vector<8x288xf32>
    %13 = vector.extract_strided_slice %1 {offsets = [0, 2], sizes = [4, 288], strides = [1, 1]} : vector<4x342xf32> to vector<4x288xf32>
    %14 = arith.truncf %13 : vector<4x288xf32> to vector<4x288xbf16>
    %c2 = arith.constant 2 : index
    %c0_8 = arith.constant 0 : index
    %c0_9 = arith.constant 0 : index
    %15 = vector.load %arg2[%c2, %c0_8, %c0_9] : memref<9x8x4xbf16, #tpu.memory_space<vmem>>, vector<1x8x4xbf16>
    %16 = vector.shape_cast %15 : vector<1x8x4xbf16> to vector<8x4xbf16>
    %cst_10 = arith.constant dense<0.000000e+00> : vector<8x288xf32>
    %17 = tpu.matmul %16, %14, %cst_10 {dimension_numbers = #tpu.dot_dimension_numbers<[1], [0], [0], [1], [0, 0, 1, 1], [], []>} : vector<8x4xbf16>, vector<4x288xbf16>, vector<8x288xf32> -> vector<8x288xf32>
    %18 = arith.addf %12, %17 : vector<8x288xf32>
    %19 = vector.extract_strided_slice %1 {offsets = [0, 18], sizes = [4, 288], strides = [1, 1]} : vector<4x342xf32> to vector<4x288xf32>
    %20 = arith.truncf %19 : vector<4x288xf32> to vector<4x288xbf16>
    %c3 = arith.constant 3 : index
    %c0_11 = arith.constant 0 : index
    %c0_12 = arith.constant 0 : index
    %21 = vector.load %arg2[%c3, %c0_11, %c0_12] : memref<9x8x4xbf16, #tpu.memory_space<vmem>>, vector<1x8x4xbf16>
    %22 = vector.shape_cast %21 : vector<1x8x4xbf16> to vector<8x4xbf16>
    %cst_13 = arith.constant dense<0.000000e+00> : vector<8x288xf32>
    %23 = tpu.matmul %22, %20, %cst_13 {dimension_numbers = #tpu.dot_dimension_numbers<[1], [0], [0], [1], [0, 0, 1, 1], [], []>} : vector<8x4xbf16>, vector<4x288xbf16>, vector<8x288xf32> -> vector<8x288xf32>
    %24 = arith.addf %18, %23 : vector<8x288xf32>
    %25 = vector.extract_strided_slice %1 {offsets = [0, 19], sizes = [4, 288], strides = [1, 1]} : vector<4x342xf32> to vector<4x288xf32>
    %26 = arith.truncf %25 : vector<4x288xf32> to vector<4x288xbf16>
    %c4 = arith.constant 4 : index
    %c0_14 = arith.constant 0 : index
    %c0_15 = arith.constant 0 : index
    %27 = vector.load %arg2[%c4, %c0_14, %c0_15] : memref<9x8x4xbf16, #tpu.memory_space<vmem>>, vector<1x8x4xbf16>
    %28 = vector.shape_cast %27 : vector<1x8x4xbf16> to vector<8x4xbf16>
    %cst_16 = arith.constant dense<0.000000e+00> : vector<8x288xf32>
    %29 = tpu.matmul %28, %26, %cst_16 {dimension_numbers = #tpu.dot_dimension_numbers<[1], [0], [0], [1], [0, 0, 1, 1], [], []>} : vector<8x4xbf16>, vector<4x288xbf16>, vector<8x288xf32> -> vector<8x288xf32>
    %30 = arith.addf %24, %29 : vector<8x288xf32>
    %31 = vector.extract_strided_slice %1 {offsets = [0, 20], sizes = [4, 288], strides = [1, 1]} : vector<4x342xf32> to vector<4x288xf32>
    %32 = arith.truncf %31 : vector<4x288xf32> to vector<4x288xbf16>
    %c5 = arith.constant 5 : index
    %c0_17 = arith.constant 0 : index
    %c0_18 = arith.constant 0 : index
    %33 = vector.load %arg2[%c5, %c0_17, %c0_18] : memref<9x8x4xbf16, #tpu.memory_space<vmem>>, vector<1x8x4xbf16>
    %34 = vector.shape_cast %33 : vector<1x8x4xbf16> to vector<8x4xbf16>
    %cst_19 = arith.constant dense<0.000000e+00> : vector<8x288xf32>
    %35 = tpu.matmul %34, %32, %cst_19 {dimension_numbers = #tpu.dot_dimension_numbers<[1], [0], [0], [1], [0, 0, 1, 1], [], []>} : vector<8x4xbf16>, vector<4x288xbf16>, vector<8x288xf32> -> vector<8x288xf32>
    %36 = arith.addf %30, %35 : vector<8x288xf32>
    %37 = vector.extract_strided_slice %1 {offsets = [0, 36], sizes = [4, 288], strides = [1, 1]} : vector<4x342xf32> to vector<4x288xf32>
    %38 = arith.truncf %37 : vector<4x288xf32> to vector<4x288xbf16>
    %c6 = arith.constant 6 : index
    %c0_20 = arith.constant 0 : index
    %c0_21 = arith.constant 0 : index
    %39 = vector.load %arg2[%c6, %c0_20, %c0_21] : memref<9x8x4xbf16, #tpu.memory_space<vmem>>, vector<1x8x4xbf16>
    %40 = vector.shape_cast %39 : vector<1x8x4xbf16> to vector<8x4xbf16>
    %cst_22 = arith.constant dense<0.000000e+00> : vector<8x288xf32>
    %41 = tpu.matmul %40, %38, %cst_22 {dimension_numbers = #tpu.dot_dimension_numbers<[1], [0], [0], [1], [0, 0, 1, 1], [], []>} : vector<8x4xbf16>, vector<4x288xbf16>, vector<8x288xf32> -> vector<8x288xf32>
    %42 = arith.addf %36, %41 : vector<8x288xf32>
    %43 = vector.extract_strided_slice %1 {offsets = [0, 37], sizes = [4, 288], strides = [1, 1]} : vector<4x342xf32> to vector<4x288xf32>
    %44 = arith.truncf %43 : vector<4x288xf32> to vector<4x288xbf16>
    %c7 = arith.constant 7 : index
    %c0_23 = arith.constant 0 : index
    %c0_24 = arith.constant 0 : index
    %45 = vector.load %arg2[%c7, %c0_23, %c0_24] : memref<9x8x4xbf16, #tpu.memory_space<vmem>>, vector<1x8x4xbf16>
    %46 = vector.shape_cast %45 : vector<1x8x4xbf16> to vector<8x4xbf16>
    %cst_25 = arith.constant dense<0.000000e+00> : vector<8x288xf32>
    %47 = tpu.matmul %46, %44, %cst_25 {dimension_numbers = #tpu.dot_dimension_numbers<[1], [0], [0], [1], [0, 0, 1, 1], [], []>} : vector<8x4xbf16>, vector<4x288xbf16>, vector<8x288xf32> -> vector<8x288xf32>
    %48 = arith.addf %42, %47 : vector<8x288xf32>
    %49 = vector.extract_strided_slice %1 {offsets = [0, 38], sizes = [4, 288], strides = [1, 1]} : vector<4x342xf32> to vector<4x288xf32>
    %50 = arith.truncf %49 : vector<4x288xf32> to vector<4x288xbf16>
    %c8 = arith.constant 8 : index
    %c0_26 = arith.constant 0 : index
    %c0_27 = arith.constant 0 : index
    %51 = vector.load %arg2[%c8, %c0_26, %c0_27] : memref<9x8x4xbf16, #tpu.memory_space<vmem>>, vector<1x8x4xbf16>
    %52 = vector.shape_cast %51 : vector<1x8x4xbf16> to vector<8x4xbf16>
    %cst_28 = arith.constant dense<0.000000e+00> : vector<8x288xf32>
    %53 = tpu.matmul %52, %50, %cst_28 {dimension_numbers = #tpu.dot_dimension_numbers<[1], [0], [0], [1], [0, 0, 1, 1], [], []>} : vector<8x4xbf16>, vector<4x288xbf16>, vector<8x288xf32> -> vector<8x288xf32>
    %54 = arith.addf %48, %53 : vector<8x288xf32>
    %c0_29 = arith.constant 0 : index
    %c0_30 = arith.constant 0 : index
    %55 = vector.load %arg3[%c0_29, %c0_30] : memref<8x1xf32, #tpu.memory_space<vmem>>, vector<8x1xf32>
    %56 = vector.broadcast %55 : vector<8x1xf32> to vector<8x288xf32>
    %57 = arith.addf %54, %56 : vector<8x288xf32>
    %58 = arith.negf %57 : vector<8x288xf32>
    %59 = math.exp %58 : vector<8x288xf32>
    %cst_31 = arith.constant 1.000000e+00 : f32
    %60 = vector.broadcast %cst_31 : f32 to vector<8x288xf32>
    %61 = arith.addf %60, %59 : vector<8x288xf32>
    %62 = arith.divf %60, %61 : vector<8x288xf32>
    %63 = arith.mulf %57, %62 : vector<8x288xf32>
    %c0_32 = arith.constant 0 : index
    %c0_33 = arith.constant 0 : index
    %64 = vector.load %arg4[%c0_32, %c0_33] : memref<4x8xbf16, #tpu.memory_space<vmem>>, vector<4x8xbf16>
    %65 = arith.truncf %63 : vector<8x288xf32> to vector<8x288xbf16>
    %cst_34 = arith.constant dense<0.000000e+00> : vector<4x288xf32>
    %66 = tpu.matmul %64, %65, %cst_34 {dimension_numbers = #tpu.dot_dimension_numbers<[1], [0], [0], [1], [0, 0, 1, 1], [], []>} : vector<4x8xbf16>, vector<8x288xbf16>, vector<4x288xf32> -> vector<4x288xf32>
    %c0_35 = arith.constant 0 : index
    %c0_36 = arith.constant 0 : index
    %67 = vector.load %arg5[%c0_35, %c0_36] : memref<4x1xf32, #tpu.memory_space<vmem>>, vector<4x1xf32>
    %68 = vector.broadcast %67 : vector<4x1xf32> to vector<4x288xf32>
    %69 = arith.addf %66, %68 : vector<4x288xf32>
    %70 = vector.extract_strided_slice %1 {offsets = [0, 19], sizes = [4, 288], strides = [1, 1]} : vector<4x342xf32> to vector<4x288xf32>
    %71 = arith.addf %70, %69 : vector<4x288xf32>
    %c0_37 = arith.constant 0 : index
    %c0_38 = arith.constant 0 : index
    %c0_39 = arith.constant 0 : index
    %72 = vector.load %arg6[%c0_37, %c0_38, %c0_39] : memref<1x4x288xf32, #tpu.memory_space<vmem>>, vector<1x4x288xf32>
    %73 = vector.shape_cast %72 : vector<1x4x288xf32> to vector<4x288xf32>
    %74 = vector.shape_cast %71 : vector<4x288xf32> to vector<1x4x288xf32>
    tpu.vector_store %arg6[%c0_37, %c0_38, %c0_39], %74 {strides = array<i32>} : memref<1x4x288xf32, #tpu.memory_space<vmem>>, vector<1x4x288xf32>,
    return
  }
  func.func @transform_0(%arg0: i32) -> (i32, i32, i32) {
    %c0_i32 = arith.constant 0 : i32
    %c0_i32_0 = arith.constant 0 : i32
    %c0_i32_1 = arith.constant 0 : i32
    return %arg0, %c0_i32, %c0_i32_0 : i32, i32, i32
  }
  func.func @transform_1(%arg0: i32) -> (i32, i32, i32) {
    %c0_i32 = arith.constant 0 : i32
    %c0_i32_0 = arith.constant 0 : i32
    %c0_i32_1 = arith.constant 0 : i32
    %c0_i32_2 = arith.constant 0 : i32
    return %c0_i32, %c0_i32_0, %c0_i32_1 : i32, i32, i32
  }
  func.func @transform_2(%arg0: i32) -> (i32, i32) {
    %c0_i32 = arith.constant 0 : i32
    %c0_i32_0 = arith.constant 0 : i32
    %c0_i32_1 = arith.constant 0 : i32
    return %c0_i32, %c0_i32_0 : i32, i32
  }
  func.func @transform_3(%arg0: i32) -> (i32, i32) {
    %c0_i32 = arith.constant 0 : i32
    %c0_i32_0 = arith.constant 0 : i32
    %c0_i32_1 = arith.constant 0 : i32
    return %c0_i32, %c0_i32_0 : i32, i32
  }
  func.func @transform_4(%arg0: i32) -> (i32, i32) {
    %c0_i32 = arith.constant 0 : i32
    %c0_i32_0 = arith.constant 0 : i32
    %c0_i32_1 = arith.constant 0 : i32
    return %c0_i32, %c0_i32_0 : i32, i32
  }
  func.func @transform_5(%arg0: i32) -> (i32, i32, i32) {
    %c0_i32 = arith.constant 0 : i32
    %c0_i32_0 = arith.constant 0 : i32
    %c0_i32_1 = arith.constant 0 : i32
    return %arg0, %c0_i32, %c0_i32_0 : i32, i32, i32
  }
}

</mosaic_0001>

<bundles_post_ra>
// kernel: tpu_custom_call.1
= control target key start
LH: loop header
LB: loop body
LE: loop exit
PB: predicated region body
PF: predicated region fallthrough
CT: control target
= control target key end

     0   :  { %10 = vsyncpa [#allocation3], 0  ;;  %s1970_s0 = inlined_call_operand.vmem [shape: f32[2,4,342], index: 0, kind: input, shape index: {}]   ;;  %s1971_s1 = inlined_call_operand.vmem [shape: bf16[9,8,4], index: 1, kind: input, shape index: {}]   ;;  %s1972_s2 = inlined_call_operand.vmem [shape: f32[8,1], index: 2, kind: input, shape index: {}]   ;;  %s1973_s3 = inlined_call_operand.vmem [shape: bf16[4,8], index: 3, kind: input, shape index: {}]   ;;  %s1974_s4 = inlined_call_operand.vmem [shape: f32[4,1], index: 4, kind: input, shape index: {}]   ;;  %s1975_s5 = inlined_call_operand.hbm [shape: f32[2,4,288], index: 5, kind: output, shape index: {}]  }
   0x1   :  { %12 = vsyncpa [#allocation3 + $0x1], 0  ;;  %s1728_s18 = smov 0   ;;  %s1730_s19 = smov 0  }
   0x2   :  { %s1732_s20 = smov 0   ;;  %s1734_s21 = smov 0  }
   0x3 LB: > { %s1749_s22 = sadd.s32 4294967295, %s1683_s21   ;;  %s1425_s23 = sadd.s32 4294967294, %s1683_s21   ;;  %s1683_s21 = sphi %s1734_s21, %s1981_s21   ;;  %s1679_s20 = sphi %s1732_s20, %s1980_s20   ;;  %s1675_s19 = sphi %s1730_s19, %s1979_s19   ;;  %s1671_s18 = sphi %s1728_s18, %s1978_s18  }
   0x4   : > { %s1753_s24 = sadd.s32 1, %s1683_s21   ;;  %s135_s25 = sadd.s32 1, %s1679_s20 }
   0x5   : > { %s132_s26 = ssub.s32 %s1683_s21, %s1753_s24  ;;  %p145_p0 = scmp.ne.s32.totalorder %s1679_s20, %s1675_s19 }
   0x6   : > { %p133_p1 = scmp.eq.s32.totalorder %s132_s26, 0  ;;  %p146_p2 = scmp.eq.s32.totalorder %s1749_s22, 1 }
   0x7   : > { %p151_p3 = scmp.ne.s32.totalorder %s1675_s19, %s1671_s18  ;;  %p152_p4 = scmp.eq.s32.totalorder %s1425_s23, 1 }
   0x8   : > { %s1764_s27 = scalar_select %p133_p1, %s1679_s20, %s135_s25  }
   0x9   : > { %p1766_p5 = por %p146_p2, %p145_p0  ;;  %p1770_p6 = por %p152_p4, %p151_p3 }
   0xa   : > { %p1428_p7 = scmp.ge.s32.totalorder %s1683_s21, 1  ;;  %p190_p8 = scmp.lt.s32.totalorder %s1683_s21, 3 }
   0xc   : > { %p191_p9 = pnand %p1428_p7, %p190_p8 }
   0xd   : > { %p218_p10 = scmp.lt.s32.totalorder (!%p191_p9), %s1749_s22, 1  ;;  %s1688_s10 = smov (!%p191_p9), 127  }
   0xe   : > { %194 = sbr.rel (%p191_p9) target bundleno = 905 (0x389), region = 40  ;;  %s1689_s11 = smov (!%p191_p9), 126  }
   0xf   : > { %s1690_s12 = smov (!%p191_p9), 110   ;;  %s1691_s13 = smov (!%p191_p9), 109  }
  0x10   : > { %s1692_s14 = smov (!%p191_p9), 108   ;;  %s1693_s15 = smov (!%p191_p9), 92  }
  0x11   : > { %s1694_s16 = smov (!%p191_p9), 91   ;;  %s1695_s17 = smov (!%p191_p9), 90  }
  0x13   : > { %v1685_v0 = vmov 0.0   ;;  %vm1686_vm0 = vmmov 0   ;;  %s219_s30 = scalar_select %p218_p10, %s1749_s22, 1  ;;  %v1687_v1 = vmov 0   ;;  %v1184_v8 = vld [vmem:[%s1972_s2] sm:$0xff]  ;;  %vm251_vm1 = vcmask 1041408  }
  0x14   : > { %1494 = vmatprep.subr.bf16.mxu1 %v1685_v0  ;;  %1496 = vmatprep.mubr.msk.bf16.mxu1 %vm1686_vm0, %v1685_v0  ;;  %v1430_v12 = vld [vmem:[%s1971_s1 + $0x4] sm:$0xf]  ;;  %vm247_vm2 = vcmask 31744   ;;  %vm244_vm3 = vcmask 1039360   ;;  %vm443_vm4 = vcmask 1031168   ;;  %vm550_vm5 = vcmask 900096  }
  0x15   : > { %s1555_s6 = smul.u32 12, %s219_s30  ;;  %293 = vmatprep.mubr.bf16.mxu0 %v1687_v1  ;;  %1608 = vset.pattern.permute.xlu0 %v1687_v1  ;;  %v232_v23 = vld [vmem:[%s1971_s1] sm:$0xf]  ;;  %v1437_v32 = vld [vmem:[%s1971_s1 + $0x8] sm:$0xf]  ;;  %vm657_vm6 = vcmask 891904  }
  0x16   : > { %1609 = vset.pattern.permute.xlu1 %v1687_v1  ;;  %v1441_v40 = vld [vmem:[%s1971_s1 + $0xc] sm:$0xf]  ;;  %vm764_vm7 = vcmask 883712   ;;  %v1445_v48 = vld [vmem:[%s1971_s1 + $0x10] sm:$0xf]  ;;  %vm871_vm8 = vcmask 752640  }
  0x17   : > { %s222_s9 = scalar_lea.vmem %s1970_s0, %s1555_s6  ;;  %v1449_v56 = vld [vmem:[%s1971_s1 + $0x14] sm:$0xf]  ;;  %vm978_vm9 = vcmask 744448   ;;  %vm1085_vm10 = vcmask 736256   ;;  %vm1228_vm11 = vcmask 1043456   ;;  %vm1224_vm12 = vcmask 64512  }
  0x18   : > { %v1787_v2 = vld [vmem:[%s222_s9 + $0x8] sm:$0xf]  ;;  %v1789_v3 = vld [vmem:[%s222_s9] sm:$0xff]  ;;  %vm1328_vm13 = vcmask 154624   ;;  %vm1349_vm14 = vcmask 257024   ;;  %s1697_s30 = smov [#allocation2]  }
  0x19   : > { %v231_v4 = vpack.c.bf16 %v1787_v2, %v1787_v2  ;;  %v229_v5 = vpack.c.bf16 %v1789_v3, %v1789_v3  ;;  %v227_v6 = vcombine.high %v1789_v3, %v1789_v3  ;;  %s1627_s6 = sshll.u32 %s1697_s30, 4  ;;  %s1628_s6 = int_to_ptr.vmem [resolvable:$false] %s1627_s6 }
  0x1a   : > { %s1629_s7 = scalar_lea.vmem %s1628_s6, 384 }
  0x1b   : > { %242 = vrot.lane.b32.xlu1 %v231_v4, %s1688_s10  ;;  %238 = vrot.lane.b32.xlu0 %v229_v5, %s1688_s10  ;;  %v230_v7 = vpack.c.bf16 %v227_v6, %v227_v6  ;;  %v352_v13 = vsel %vm251_vm1, %v231_v4, 0  ;;  %v346_v19 = vsel %vm251_vm1, %v229_v5, 0 }
  0x1f   : > { %240 = vrot.lane.b32.xlu0 %v230_v7, %s1688_s10  ;;  %437 = vrot.lane.b32.xlu1 %v229_v5, %s1689_s11 }
  0x23   : > { %441 = vrot.lane.b32.xlu1 %v231_v4, %s1689_s11  ;;  %439 = vrot.lane.b32.xlu0 %v230_v7, %s1689_s11  ;;  %s1696_s11 = smov 19  }
  0x27   : > { %544 = vrot.lane.b32.xlu0 %v229_v5, %s1690_s12  ;;  %546 = vrot.lane.b32.xlu1 %v230_v7, %s1690_s12 }
  0x2b   : > { %548 = vrot.lane.b32.xlu0 %v231_v4, %s1690_s12  ;;  %651 = vrot.lane.b32.xlu1 %v229_v5, %s1691_s13  ;;  %s215_s12 = sand.u32 1, %s1675_s19  }
  0x2f   : > { %655 = vrot.lane.b32.xlu1 %v231_v4, %s1691_s13  ;;  %653 = vrot.lane.b32.xlu0 %v230_v7, %s1691_s13 }
  0x33   : > { %758 = vrot.lane.b32.xlu0 %v229_v5, %s1692_s14  ;;  %760 = vrot.lane.b32.xlu1 %v230_v7, %s1692_s14 }
  0x37   : > { %762 = vrot.lane.b32.xlu0 %v231_v4, %s1692_s14  ;;  %865 = vrot.lane.b32.xlu1 %v229_v5, %s1693_s15  ;;  %s1554_s14 = smul.u32 12, %s215_s12 }
  0x3b   : > { %869 = vrot.lane.b32.xlu1 %v231_v4, %s1693_s15  ;;  %867 = vrot.lane.b32.xlu0 %v230_v7, %s1693_s15  ;;  %s1556_s15 = smul.u32 192, %s1749_s22  ;;  %s1352_s22 = scalar_lea.sflag [#allocation3], %s215_s12 }
  0x3d   : > { %s1934_s26 = scalar_lea.hbm %s1975_s5, %s1556_s15 }
  0x3f   : > { %972 = vrot.lane.b32.xlu0 %v229_v5, %s1694_s16  ;;  %974 = vrot.lane.b32.xlu1 %v230_v7, %s1694_s16 }
  0x43   : > { %976 = vrot.lane.b32.xlu0 %v231_v4, %s1694_s16  ;;  %1079 = vrot.lane.b32.xlu1 %v229_v5, %s1695_s17  ;;  %s217_s16 = scalar_lea.vmem [#allocation2], %s1554_s14 }
  0x47   : > { %1083 = vrot.lane.b32.xlu1 %v231_v4, %s1695_s17  ;;  %1081 = vrot.lane.b32.xlu0 %v230_v7, %s1695_s17  ;;  %v1453_v4 = vld [vmem:[%s1971_s1 + $0x18] sm:$0xf]  ;;  %s1366_s17 = sshll.u32 %s217_s16, 4  ;;  %s1367_s17 = int_to_ptr.vmem [resolvable:$true] %s1366_s17 }
  0x48   : > { %p1630_p0 = scmp.lt.s32.totalorder %s1367_s17, %s1628_s6 }
  0x4b   : > { %1187 = vperm.xlu0 %1608, %v1184_v8  }
  0x8d   : > { %v243_v9 = vpop.permute.xlu1 %242  ;;  %v239_v10 = vpop.permute.xlu0 %238 }
  0x8e   : > { %v259_v11 = vsel %vm251_vm1, %v243_v9, 0 }
  0x8f   : > { %1495 = vmatpush3.bf16.msra.mxu1 %v259_v11  ;;  %v1457_v11 = vld [vmem:[%s1971_s1 + $0x1c] sm:$0xf] }
  0x90   : > { %1500 = vmatprep.subr.bf16.mxu1 %v1685_v0 }
  0x91   : > { %v241_v14 = vpop.permute.xlu0 %240  ;;  %v438_v15 = vpop.permute.xlu1 %437 }
  0x92   : > { %1497 = vmatmul.mubr.msk.bf16.vlgmr.msra.gmra.mxu1 %vm247_vm2, %v1430_v12  ;;  %v246_v16 = vsel %vm244_vm3, %v241_v14, %v243_v9  ;;  %v245_v17 = vsel %vm244_vm3, %v239_v10, %v241_v14 }
  0x93   : > { %1431 = vmatprep.subr.msk.bf16.mxu0 %vm251_vm1, %v246_v16  ;;  %v253_v18 = vsel %vm251_vm1, %v245_v17, 0  ;;  %1501 = vmatpush3.bf16.msra.mxu1 %v352_v13  ;;  %v1218_v16 = vld [vmem:[%s1974_s4] sm:$0xf] }
  0x94   : > { %276 = vmatpush1.bf16.msra.mxu0 %v253_v18  ;;  %1502 = vmatprep.mubr.msk.bf16.mxu1 %vm1686_vm0, %v1685_v0 }
  0x95   : > { %1434 = vmatprep.subr.msk.bf16.mxu0 %vm251_vm1, %v230_v7  ;;  %v442_v20 = vpop.permute.xlu1 %441  ;;  %v440_v21 = vpop.permute.xlu0 %439  ;;  %1506 = vmatprep.subr.bf16.mxu1 %v1685_v0 }
  0x96   : > { %v445_v22 = vsel %vm443_vm4, %v440_v21, %v442_v20  ;;  %v456_v24 = vsel %vm251_vm1, %v442_v20, 0  ;;  %v444_v27 = vsel %vm443_vm4, %v438_v15, %v440_v21  ;;  %v1461_v15 = vld [vmem:[%s1971_s1 + $0x20] sm:$0xf]  ;;  %1221 = vperm.xlu1 %1609, %v1218_v16  }
  0x97   : > { %1432 = vmatmul.mubr.msk.bf16.vlgmr.msra.gmra.mxu0 %vm247_vm2, %v1430_v12  ;;  %v450_v28 = vsel %vm251_vm1, %v444_v27, 0 }
  0x98   : > { %369 = vmatpush1.bf16.msra.mxu0 %v346_v19  ;;  %386 = vmatprep.mubr.bf16.mxu0 %v1687_v1 }
  0x99   : > { %1438 = vmatprep.subr.msk.bf16.mxu0 %vm251_vm1, %v445_v22  ;;  %v545_v25 = vpop.permute.xlu0 %544  ;;  %v547_v26 = vpop.permute.xlu1 %546 }
  0x9a   : > { %1503 = vmatmul.mubr.msk.bf16.vlgmr.msra.gmra.mxu1 %vm247_vm2, %v232_v23  ;;  %v551_v35 = vsel %vm550_vm5, %v545_v25, %v547_v26 }
  0x9b   : > { %1507 = vmatpush3.bf16.msra.mxu1 %v456_v24  ;;  %1508 = vmatprep.mubr.msk.bf16.mxu1 %vm1686_vm0, %v1685_v0  ;;  %v557_v37 = vsel %vm251_vm1, %v551_v35, 0 }
  0x9c   : > { %1512 = vmatprep.subr.bf16.mxu1 %v1685_v0 }
  0x9d   : > { %v549_v29 = vpop.permute.xlu0 %548  ;;  %v652_v30 = vpop.permute.xlu1 %651 }
  0x9e   : > { %v552_v31 = vsel %vm550_vm5, %v547_v26, %v549_v29  ;;  %v563_v33 = vsel %vm251_vm1, %v549_v29, 0 }
  0x9f   : > { %1435 = vmatmul.mubr.msk.bf16.vlgmr.msra.gmra.mxu0 %vm247_vm2, %v232_v23 }
  0xa0   : > { %473 = vmatpush1.bf16.msra.mxu0 %v450_v28  ;;  %490 = vmatprep.mubr.bf16.mxu0 %v1687_v1 }
  0xa1   : > { %1442 = vmatprep.subr.msk.bf16.mxu0 %vm251_vm1, %v552_v31  ;;  %v654_v34 = vpop.permute.xlu0 %653  ;;  %v656_v36 = vpop.permute.xlu1 %655 }
  0xa2   : > { %1509 = vmatmul.mubr.msk.bf16.vlgmr.msra.gmra.mxu1 %vm247_vm2, %v1437_v32  ;;  %v659_v39 = vsel %vm657_vm6, %v654_v34, %v656_v36  ;;  %v670_v42 = vsel %vm251_vm1, %v656_v36, 0  ;;  %v658_v43 = vsel %vm657_vm6, %v652_v30, %v654_v34 }
  0xa3   : > { %1513 = vmatpush3.bf16.msra.mxu1 %v563_v33  ;;  %1514 = vmatprep.mubr.msk.bf16.mxu1 %vm1686_vm0, %v1685_v0  ;;  %v664_v45 = vsel %vm251_vm1, %v658_v43, 0 }
  0xa4   : > { %1518 = vmatprep.subr.bf16.mxu1 %v1685_v0 }
  0xa5   : > { %v759_v38 = vpop.permute.xlu0 %758  ;;  %v761_v41 = vpop.permute.xlu1 %760 }
  0xa6   : > { %v765_v51 = vsel %vm764_vm7, %v759_v38, %v761_v41 }
  0xa7   : > { %1439 = vmatmul.mubr.msk.bf16.vlgmr.msra.gmra.mxu0 %vm247_vm2, %v1437_v32  ;;  %v771_v53 = vsel %vm251_vm1, %v765_v51, 0 }
  0xa8   : > { %580 = vmatpush1.bf16.msra.mxu0 %v557_v37  ;;  %597 = vmatprep.mubr.bf16.mxu0 %v1687_v1 }
  0xa9   : > { %1446 = vmatprep.subr.msk.bf16.mxu0 %vm251_vm1, %v659_v39  ;;  %v763_v44 = vpop.permute.xlu0 %762  ;;  %v866_v46 = vpop.permute.xlu1 %865 }
  0xaa   : > { %1515 = vmatmul.mubr.msk.bf16.vlgmr.msra.gmra.mxu1 %vm247_vm2, %v1441_v40  ;;  %v766_v47 = vsel %vm764_vm7, %v761_v41, %v763_v44  ;;  %v777_v50 = vsel %vm251_vm1, %v763_v44, 0 }
  0xab   : > { %1519 = vmatpush3.bf16.msra.mxu1 %v670_v42  ;;  %1520 = vmatprep.mubr.msk.bf16.mxu1 %vm1686_vm0, %v1685_v0 }
  0xac   : > { %1524 = vmatprep.subr.bf16.mxu1 %v1685_v0 }
  0xad   : > { %v868_v49 = vpop.permute.xlu0 %867  ;;  %v870_v52 = vpop.permute.xlu1 %869 }
  0xae   : > { %v873_v55 = vsel %vm871_vm8, %v868_v49, %v870_v52  ;;  %v884_v58 = vsel %vm251_vm1, %v870_v52, 0  ;;  %v872_v59 = vsel %vm871_vm8, %v866_v46, %v868_v49 }
  0xaf   : > { %1443 = vmatmul.mubr.msk.bf16.vlgmr.msra.gmra.mxu0 %vm247_vm2, %v1441_v40  ;;  %v878_v61 = vsel %vm251_vm1, %v872_v59, 0 }
  0xb0   : > { %687 = vmatpush1.bf16.msra.mxu0 %v664_v45  ;;  %704 = vmatprep.mubr.bf16.mxu0 %v1687_v1 }
  0xb1   : > { %1450 = vmatprep.subr.msk.bf16.mxu0 %vm251_vm1, %v766_v47  ;;  %v973_v54 = vpop.permute.xlu0 %972  ;;  %v975_v57 = vpop.permute.xlu1 %974 }
  0xb2   : > { %1521 = vmatmul.mubr.msk.bf16.vlgmr.msra.gmra.mxu1 %vm247_vm2, %v1445_v48  ;;  %v979_v6 = vsel %vm978_vm9, %v973_v54, %v975_v57 }
  0xb3   : > { %1525 = vmatpush3.bf16.msra.mxu1 %v777_v50  ;;  %1526 = vmatprep.mubr.msk.bf16.mxu1 %vm1686_vm0, %v1685_v0  ;;  %v985_v9 = vsel %vm251_vm1, %v979_v6, 0 }
  0xb4   : > { %1530 = vmatprep.subr.bf16.mxu1 %v1685_v0 }
  0xb5   : > { %v977_v60 = vpop.permute.xlu0 %976  ;;  %v1080_v62 = vpop.permute.xlu1 %1079 }
  0xb6   : > { %v980_v63 = vsel %vm978_vm9, %v975_v57, %v977_v60  ;;  %v991_v5 = vsel %vm251_vm1, %v977_v60, 0 }
  0xb7   : > { %1447 = vmatmul.mubr.msk.bf16.vlgmr.msra.gmra.mxu0 %vm247_vm2, %v1445_v48 }
  0xb8   : > { %794 = vmatpush1.bf16.msra.mxu0 %v771_v53  ;;  %811 = vmatprep.mubr.bf16.mxu0 %v1687_v1 }
  0xb9   : > { %1454 = vmatprep.subr.msk.bf16.mxu0 %vm251_vm1, %v873_v55  ;;  %v1084_v7 = vpop.permute.xlu1 %1083  ;;  %v1082_v8 = vpop.permute.xlu0 %1081 }
  0xba   : > { %1527 = vmatmul.mubr.msk.bf16.vlgmr.msra.gmra.mxu1 %vm247_vm2, %v1449_v56  ;;  %v1087_v10 = vsel %vm1085_vm10, %v1082_v8, %v1084_v7  ;;  %v1098_v12 = vsel %vm251_vm1, %v1084_v7, 0  ;;  %v1086_v13 = vsel %vm1085_vm10, %v1080_v62, %v1082_v8 }
  0xbb   : > { %1531 = vmatpush3.bf16.msra.mxu1 %v884_v58  ;;  %1532 = vmatprep.mubr.msk.bf16.mxu1 %vm1686_vm0, %v1685_v0  ;;  %v1092_v14 = vsel %vm251_vm1, %v1086_v13, 0 }
  0xbc   : > { %1536 = vmatprep.subr.bf16.mxu1 %v1685_v0 }
  0xbf   : > { %1451 = vmatmul.mubr.msk.bf16.vlgmr.msra.gmra.mxu0 %vm247_vm2, %v1449_v56 }
  0xc0   : > { %901 = vmatpush1.bf16.msra.mxu0 %v878_v61  ;;  %918 = vmatprep.mubr.bf16.mxu0 %v1687_v1 }
  0xc1   : > { %1458 = vmatprep.subr.msk.bf16.mxu0 %vm251_vm1, %v980_v63 }
  0xc2   : > { %1533 = vmatmul.mubr.msk.bf16.vlgmr.msra.gmra.mxu1 %vm247_vm2, %v1453_v4 }
  0xc3   : > { %1537 = vmatpush3.bf16.msra.mxu1 %v991_v5  ;;  %1538 = vmatprep.mubr.msk.bf16.mxu1 %vm1686_vm0, %v1685_v0 }
  0xc4   : > { %1542 = vmatprep.subr.bf16.mxu1 %v1685_v0 }
  0xc7   : > { %1455 = vmatmul.mubr.msk.bf16.vlgmr.msra.gmra.mxu0 %vm247_vm2, %v1453_v4 }
  0xc8   : > { %1008 = vmatpush1.bf16.msra.mxu0 %v985_v9  ;;  %1025 = vmatprep.mubr.bf16.mxu0 %v1687_v1 }
  0xc9   : > { %1462 = vmatprep.subr.msk.bf16.mxu0 %vm251_vm1, %v1087_v10 }
  0xca   : > { %1539 = vmatmul.mubr.msk.bf16.vlgmr.msra.gmra.mxu1 %vm247_vm2, %v1457_v11 }
  0xcb   : > { %1543 = vmatpush3.bf16.msra.mxu1 %v1098_v12  ;;  %1544 = vmatprep.mubr.msk.bf16.mxu1 %vm1686_vm0, %v1685_v0 }
  0xcc   : > { %1548 = vmatprep.subr.bf16.mxu1 %v1685_v0 }
  0xcf   : > { %1459 = vmatmul.mubr.msk.bf16.vlgmr.msra.gmra.mxu0 %vm247_vm2, %v1457_v11 }
  0xd0   : > { %1115 = vmatpush1.bf16.msra.mxu0 %v1092_v14  ;;  %1132 = vmatprep.mubr.bf16.mxu0 %v1687_v1 }
  0xd2   : > { %1545 = vmatmul.mubr.msk.bf16.vlgmr.msra.gmra.mxu1 %vm247_vm2, %v1461_v15 }
  0xd3   : > { %1550 = vmatprep.mubr.msk.bf16.mxu1 %vm1686_vm0, %v1685_v0 }
  0xd7   : > { %1463 = vmatmul.mubr.msk.bf16.vlgmr.msra.gmra.mxu0 %vm247_vm2, %v1461_v15 }
  0xd8   : > { %1270 = vmatprep.mubr.bf16.mxu0 %v1687_v1 }
 0x152   : > { %v336_v17 = vpop.f32.mrf.mxu1 }
 0x154   : > { %v1498_v18 = vpop.f32.mrf.mxu1 }
 0x156   : > { %v339_v19 = vpop.f32.mrf.mxu1 }
 0x157   : > { %v295_v20 = vpop.f32.mrf.mxu0 }
 0x158   : > { %v1499_v21 = vpop.f32.mrf.mxu1 }
 0x159   : > { %v297_v22 = vpop.f32.mrf.mxu0 }
 0x15a   : > { %v429_v23 = vpop.f32.mrf.mxu1 }
 0x15b   : > { %v299_v24 = vpop.f32.mrf.mxu0  ;;  %v430_v62 = vadd.f32 %v429_v23, %v336_v17 }
 0x15c   : > { %v1504_v25 = vpop.f32.mrf.mxu1 }
 0x15d   : > { %v300_v26 = vpop.f32.mrf.mxu0 }
 0x15e   : > { %v432_v0 = vpop.f32.mrf.mxu1 }
 0x15f   : > { %v388_v27 = vpop.f32.mrf.mxu0 }
 0x160   : > { %v1505_v28 = vpop.f32.mrf.mxu1  ;;  %v389_v12 = vadd.f32 %v388_v27, %v295_v20 }
 0x161   : > { %v390_v29 = vpop.f32.mrf.mxu0 }
 0x162   : > { %v533_v1 = vpop.f32.mrf.mxu1  ;;  %v391_v16 = vadd.f32 %v390_v29, %v297_v22 }
 0x163   : > { %v392_v30 = vpop.f32.mrf.mxu0  ;;  %v541_v7 = vadd.f32 %v533_v1, %v430_v62 }
 0x164   : > { %v1510_v31 = vpop.f32.mrf.mxu1 }
 0x165   : > { %v393_v32 = vpop.f32.mrf.mxu0 }
 0x166   : > { %v536_v33 = vpop.f32.mrf.mxu1 }
 0x167   : > { %v492_v34 = vpop.f32.mrf.mxu0 }
 0x168   : > { %v1511_v35 = vpop.f32.mrf.mxu1  ;;  %v539_v18 = vadd.f32 %v492_v34, %v389_v12 }
 0x169   : > { %v494_v36 = vpop.f32.mrf.mxu0  ;;  %v1188_v35 = vpop.permute.xlu0 %1187 }
 0x16a   : > { %v640_v37 = vpop.f32.mrf.mxu1  ;;  %v540_v25 = vadd.f32 %v494_v36, %v391_v16 }
 0x16b   : > { %v496_v38 = vpop.f32.mrf.mxu0  ;;  %v648_v10 = vadd.f32 %v640_v37, %v541_v7 }
 0x16c   : > { %v1516_v39 = vpop.f32.mrf.mxu1 }
 0x16d   : > { %v497_v40 = vpop.f32.mrf.mxu0 }
 0x16e   : > { %v643_v41 = vpop.f32.mrf.mxu1 }
 0x16f   : > { %v599_v42 = vpop.f32.mrf.mxu0 }
 0x170   : > { %v1517_v43 = vpop.f32.mrf.mxu1  ;;  %v646_v17 = vadd.f32 %v599_v42, %v539_v18 }
 0x171   : > { %v601_v44 = vpop.f32.mrf.mxu0 }
 0x172   : > { %v747_v45 = vpop.f32.mrf.mxu1  ;;  %v647_v28 = vadd.f32 %v601_v44, %v540_v25 }
 0x173   : > { %v603_v46 = vpop.f32.mrf.mxu0  ;;  %v755_v14 = vadd.f32 %v747_v45, %v648_v10 }
 0x174   : > { %v1522_v47 = vpop.f32.mrf.mxu1 }
 0x175   : > { %v604_v48 = vpop.f32.mrf.mxu0 }
 0x176   : > { %v750_v49 = vpop.f32.mrf.mxu1 }
 0x177   : > { %v706_v50 = vpop.f32.mrf.mxu0 }
 0x178   : > { %v1523_v51 = vpop.f32.mrf.mxu1  ;;  %v753_v1 = vadd.f32 %v706_v50, %v646_v17 }
 0x179   : > { %v708_v52 = vpop.f32.mrf.mxu0 }
 0x17a   : > { %v854_v53 = vpop.f32.mrf.mxu1  ;;  %v754_v33 = vadd.f32 %v708_v52, %v647_v28 }
 0x17b   : > { %v710_v54 = vpop.f32.mrf.mxu0  ;;  %v862_v21 = vadd.f32 %v854_v53, %v755_v14  ;;  %v1222_v14 = vpop.permute.xlu1 %1221 }
 0x17c   : > { %v1528_v55 = vpop.f32.mrf.mxu1 }
 0x17d   : > { %v711_v56 = vpop.f32.mrf.mxu0 }
 0x17e   : > { %v857_v57 = vpop.f32.mrf.mxu1 }
 0x17f   : > { %v813_v58 = vpop.f32.mrf.mxu0 }
 0x180   : > { %v1529_v59 = vpop.f32.mrf.mxu1  ;;  %v860_v20 = vadd.f32 %v813_v58, %v753_v1 }
 0x181   : > { %v815_v60 = vpop.f32.mrf.mxu0 }
 0x182   : > { %v961_v61 = vpop.f32.mrf.mxu1  ;;  %v861_v29 = vadd.f32 %v815_v60, %v754_v33 }
 0x183   : > { %v817_v63 = vpop.f32.mrf.mxu0  ;;  %v969_v26 = vadd.f32 %v961_v61, %v862_v21 }
 0x184   : > { %v1534_v4 = vpop.f32.mrf.mxu1 }
 0x185   : > { %v818_v5 = vpop.f32.mrf.mxu0 }
 0x186   : > { %v964_v6 = vpop.f32.mrf.mxu1 }
 0x187   : > { %v920_v8 = vpop.f32.mrf.mxu0 }
 0x188   : > { %v1535_v9 = vpop.f32.mrf.mxu1  ;;  %v967_v34 = vadd.f32 %v920_v8, %v860_v20  ;;  %v1214_v8 = vld [vmem:[%s1973_s3] sm:$0x3] }
 0x189   : > { %v922_v11 = vpop.f32.mrf.mxu0 }
 0x18a   : > { %v1068_v13 = vpop.f32.mrf.mxu1  ;;  %v968_v40 = vadd.f32 %v922_v11, %v861_v29 }
 0x18b   : > { %v924_v15 = vpop.f32.mrf.mxu0  ;;  %v1076_v31 = vadd.f32 %v1068_v13, %v969_v26 }
 0x18c   : > { %v1540_v19 = vpop.f32.mrf.mxu1 }
 0x18d   : > { %v925_v24 = vpop.f32.mrf.mxu0 }
 0x18e   : > { %v1071_v23 = vpop.f32.mrf.mxu1 }
 0x18f   : > { %v1027_v0 = vpop.f32.mrf.mxu0 }
 0x190   : > { %v1541_v30 = vpop.f32.mrf.mxu1  ;;  %v1074_v41 = vadd.f32 %v1027_v0, %v967_v34 }
 0x191   : > { %v1029_v32 = vpop.f32.mrf.mxu0 }
 0x192   : > { %v1175_v27 = vpop.f32.mrf.mxu1  ;;  %v1075_v45 = vadd.f32 %v1029_v32, %v968_v40 }
 0x193   : > { %v1183_v37 = vadd.f32 %v1175_v27, %v1076_v31  ;;  %v1031_v22 = vpop.f32.mrf.mxu0 }
 0x194   : > { %v1546_v38 = vpop.f32.mrf.mxu1 }
 0x195   : > { %v1192_v39 = vadd.f32 %v1188_v35, %v1183_v37  ;;  %v1032_v36 = vpop.f32.mrf.mxu0 }
 0x196   : > { %v1178_v42 = vpop.f32.mrf.mxu1 }
 0x197   : > { %v1467_v43 = vmul.f32 -1.442695, %v1192_v39  ;;  %v1134_v44 = vpop.f32.mrf.mxu0 }
 0x198   : > { %v1181_v46 = vadd.f32 %v1134_v44, %v1074_v41  ;;  %v1547_v47 = vpop.f32.mrf.mxu1 }
 0x199   : > { %1611 = vpow2.f32 %v1467_v43  ;;  %v1136_v48 = vpop.f32.mrf.mxu0 }
 0x19a   : > { %v1190_v49 = vadd.f32 %v1188_v35, %v1181_v46  ;;  %v1182_v50 = vadd.f32 %v1136_v48, %v1075_v45 }
 0x19b   : > { %v1138_v51 = vpop.f32.mrf.mxu0 }
 0x19c   : > { %v1465_v52 = vmul.f32 -1.442695, %v1190_v49  ;;  %v1191_v53 = vadd.f32 %v1188_v35, %v1182_v50 }
 0x19d   : > { %v1139_v54 = vpop.f32.mrf.mxu0 }
 0x19e   : > { %1613 = vpow2.f32 %v1465_v52  ;;  %v1466_v55 = vmul.f32 -1.442695, %v1191_v53 }
 0x1a0   : > { %1615 = vpow2.f32 %v1466_v55 }
 0x1a6   : > { %v1612_v56 = vpop.eup %1611 }
 0x1a7   : > { %v1204_v57 = vadd.f32 1.0, %v1612_v56 }
 0x1a9   : > { %1617 = vrcp.f32 %v1204_v57 }
 0x1ab   : > { %v1614_v58 = vpop.eup %1613 }
 0x1ac   : > { %v1202_v59 = vadd.f32 1.0, %v1614_v58 }
 0x1ad   : > { %v1616_v60 = vpop.eup %1615 }
 0x1ae   : > { %1619 = vrcp.f32 %v1202_v59  ;;  %v1203_v61 = vadd.f32 1.0, %v1616_v60 }
 0x1b0   : > { %1621 = vrcp.f32 %v1203_v61 }
 0x1b6   : > { %v1618_v62 = vpop.eup %1617 }
 0x1b7   : > { %v1213_v63 = vmul.f32 %v1618_v62, %v1192_v39 }
 0x1b9   : > { %v1217_v4 = vpack.c.bf16 %v1213_v63, %v1213_v63 }
 0x1bb   : > { %v1620_v5 = vpop.eup %1619  ;;  %v1236_v6 = vsel %vm1228_vm11, %v1217_v4, 0 }
 0x1bc   : > { %v1211_v7 = vmul.f32 %v1620_v5, %v1190_v49  ;;  %1549 = vmatpush3.bf16.msra.mxu1 %v1236_v6 }
 0x1bd   : > { %v1622_v9 = vpop.eup %1621 }
 0x1be   : > { %v1215_v10 = vpack.c.bf16 %v1211_v7, %v1211_v7  ;;  %v1212_v11 = vmul.f32 %v1622_v9, %v1191_v53 }
 0x1bf   : > { %1551 = vmatmul.mubr.msk.bf16.vlgmr.msra.gmra.mxu1 %vm1224_vm12, %v1214_v8 }
 0x1c0   : > { %v1216_v12 = vpack.c.bf16 %v1212_v11, %v1212_v11  ;;  %v1230_v13 = vsel %vm1228_vm11, %v1215_v10, 0 }
 0x1c2   : > { %1468 = vmatprep.subr.msk.bf16.mxu0 %vm1228_vm11, %v1216_v12 }
 0x1c3   : > { %1253 = vmatpush1.bf16.msra.mxu0 %v1230_v13 }
 0x1c6   : > { %1469 = vmatmul.mubr.msk.bf16.vlgmr.msra.gmra.mxu0 %vm1224_vm12, %v1214_v8 }
 0x27f   : > { %v1313_v15 = vpop.f32.mrf.mxu1 }
 0x280   : > { %v1314_v16 = vadd.f32 %v1313_v15, %v1222_v14 }
 0x281   : > { %v1552_v18 = vpop.f32.mrf.mxu1 }
 0x282   : > { %1325 = vrot.lane.b32.xlu0 %v1314_v16, %s1696_s11 }
 0x283   : > { %v1316_v19 = vpop.f32.mrf.mxu1 }
 0x285   : > { %v1553_v21 = vpop.f32.mrf.mxu1 }
 0x286   : > { %v1272_v24 = vpop.f32.mrf.mxu0 }
 0x287   : > { %v1273_v17 = vadd.f32 %v1272_v24, %v1222_v14 }
 0x288   : > { %v1274_v25 = vpop.f32.mrf.mxu0 }
 0x289   : > { %v1275_v23 = vadd.f32 %v1274_v25, %v1222_v14 }
 0x28a   : > { %v1276_v26 = vpop.f32.mrf.mxu0 }
 0x28b   : > { %v1322_v0 = vcombine.low %v1273_v17, %v1275_v23 }
 0x28c   : > { %v1277_v28 = vpop.f32.mrf.mxu0 }
 0x28d   : > { %1323 = vrot.lane.b32.xlu1 %v1322_v0, %s1696_s11 }
 0x2f4   : > { %v1326_v31 = vpop.permute.xlu0 %1325 }
 0x2ff   : > { %v1324_v1 = vpop.permute.xlu1 %1323 }
 0x300   : > { %v1327_v30 = vrot.slane %v1324_v1, 4 }
 0x302   : > { %v1329_v32 = vsel %vm1328_vm13, %v1327_v30, %v1324_v1  ;;  %v1330_v33 = vsel %vm1328_vm13, %v1327_v30, %v1326_v31 }
 0x303   : > { %v1333_v20 = vadd.f32 %v1329_v32, %v1789_v3  ;;  %v1334_v27 = vadd.f32 %v1330_v33, %v1787_v2 }
 0x305   : > { %1339 = vrot.lane.b32.xlu0 %v1334_v27, %s1691_s13  ;;  %1337 = vrot.lane.b32.xlu1 %v1333_v20, %s1691_s13  ;;  %s1623_s13 = scalar_lea.vmem %s1367_s17, 192 }
 0x306   : > { %p1624_p11 = scmp.ne.s32.totalorder %s1367_s17, %s1623_s13  ;;  %p1631_p1 = scmp.lt.s32.totalorder %s1629_s7, %s1623_s13 }
 0x308   : > { %p1625_p12 = pnand %p1624_p11, %p1766_p5  ;;  %p1632_p2 = por %p1631_p1, %p1630_p0 }
 0x30a   : > { %p1626_p13 = pneg %p1625_p12 }
 0x30c   : > { %p1633_p3 = pnand %p1632_p2, %p1626_p13 }
 0x377   : > { %v1340_v35 = vpop.permute.xlu0 %1339  ;;  %v1338_v37 = vpop.permute.xlu1 %1337 }
 0x378   : > { %v1342_v22 = vrot.slane %v1340_v35, 4  ;;  %1350 = vst.msk [vmem:[%s217_s16 + $0x8] sm:$0xf] %vm1349_vm14, %v1340_v35  ;;  %v1341_v29 = vrot.slane %v1338_v37, 4 }
 0x37a   : > { %v1343_v3 = vsel %vm1228_vm11, %v1341_v29, %v1342_v22 }
 0x37b   : > { %v1345_v2 = vsel %vm657_vm6, %v1338_v37, %v1343_v3 }
 0x37c   : > { %1348 = vst [vmem:[%s217_s16] sm:$0xff] %v1345_v2 }
 0x37d   : > { %1636 = shalt.err (!%p1633_p3)
}
 0x37e   : > { %s1637_s8 = scalar_lea.hbm %s1934_s26, 192  ;;  %s1641_s11 = scalar_lea.hbm %s1975_s5, 384 }
 0x37f   : > { %p1638_p4 = scmp.ne.s32.totalorder %s1934_s26, %s1637_s8  ;;  %p1642_p9 = scmp.lt.s32.totalorder %s1934_s26, %s1975_s5 }
 0x380   : > { %p1643_p10 = scmp.lt.s32.totalorder %s1641_s11, %s1637_s8 }
 0x381   : > { %p1639_p7 = pnand %p1638_p4, %p1766_p5 }
 0x382   : > { %p1644_p11 = por %p1643_p10, %p1642_p9 }
 0x383   : > { %p1640_p8 = pneg %p1639_p7 }
 0x385   : > { %p1645_p12 = pnand %p1644_p11, %p1640_p8 }
 0x387   : > { %1648 = shalt.err (!%p1645_p12)
}
 0x388   : > { %1557 = dma.vmem_to_hbm [thread:$0]  (%p1766_p5), %s1367_s17, 192, %s1934_s26, %s1352_s22  }
 0x389 PF: > { %p1563_p13 = scmp.ge.s32.totalorder %s1683_s21, 2  ;;  %s1378_s15 = sand.u32 1, %s1671_s18  }
 0x38a   : > { %s1379_s16 = scalar_lea.sflag [#allocation3], %s1378_s15 }
 0x38b   : > { %p1560_p0 = pnand %p1563_p13, %p1770_p6 }
 0x38d   : > { %p1561_p1 = pneg %p1560_p0 }
 0x38f   : > { %1666 = dma.done.wait (%p1561_p1), %s1379_s16, 192  }
 0x390   : > { %1668 = vsyncadd (%p1561_p1), %s1379_s16, 4294967104  ;;  %p15_p2 = scmp.ge.s32.totalorder %s1753_s24, 4   ;;  %s1978_s18 = smov %s1675_s19 }
 0x391   : > { %s1979_s19 = smov %s1679_s20  ;;  %s1980_s20 = smov %s1764_s27 }
 0x392   : > { %s1981_s21 = smov %s1753_s24  ;;  %17 = sbr.rel (!%p15_p2) target bundleno = 3 (0x3), region = 83 }
 0x397   :  { %1384 = vsyncpa [#allocation3], 1 }
 0x398   :  { %1386 = vsyncpa [#allocation3 + $0x1], 1 }

</bundles_post_ra>
